<compile_context>
chip_gen: v7x
topology: tpu7x:2x2x1
jax: 0.10.0
libtpu: 0.0.40
codegen_flags: <defaults>
</compile_context>

<pallas_src>
import functools

import jax
import jax.numpy as jnp
from jax.experimental import pallas as pl
from jax.experimental.pallas import tpu as pltpu

EXPANSION = 4
CA_RATIO = 16
SA_KSIZE = 7
BN_EPS = 1e-5

_SMEM = pl.BlockSpec(memory_space=pltpu.MemorySpace.SMEM)
_HI = jax.lax.Precision.HIGHEST         # reference model only


def _round_up(v, m):
    return ((v + m - 1) // m) * m


@functools.lru_cache(maxsize=None)
def _vmem_limit():
    """Per-generation VMEM budget: ~3/4 of physical, capped at 100 MiB."""
    try:
        cap = int(pltpu.get_tpu_info().vmem_capacity_bytes)
    except Exception:
        cap = 64 * 1024 * 1024
    return min(cap * 3 // 4, 100 * 1024 * 1024)


def _pick_tile(dim, preferred, cap):
    """Largest preferred tile that divides dim; else full extent (<= cap); else pad."""
    for t in preferred:
        if t <= dim and dim % t == 0:
            return t
    if dim <= cap:
        return dim
    return preferred[0]


# ----------------------------- Pallas kernels -----------------------------

def _matmul_affine_act_kernel(x_ref, w_ref, s_ref, b_ref, o_ref, acc_ref, *, act):
    """Tiled o = act((x @ w) * scale + bias); K is the last (accumulation) grid axis."""
    prod = jnp.dot(x_ref[...], w_ref[...], preferred_element_type=jnp.float32)

    @pl.when(pl.program_id(2) == 0)
    def _():
        acc_ref[...] = prod                      # init folded into first K step

    @pl.when(pl.program_id(2) > 0)
    def _():
        acc_ref[...] += prod

    @pl.when(pl.program_id(2) == pl.num_programs(2) - 1)
    def _():
        y = acc_ref[...] * s_ref[...] + b_ref[...]
        if act == "relu":
            y = jnp.maximum(y, 0.0)
        elif act == "sigmoid":
            y = jax.nn.sigmoid(y)
        o_ref[...] = y.astype(o_ref.dtype)


def _conv3x3_bn_relu_kernel(x_ref, w_ref, s_ref, b_ref, o_ref, acc_ref,
                            *, ho, wo, stride):
    """Per-image 3x3 conv: 9 shifted-window matmuls accumulated in VMEM (no HBM im2col)."""
    cin = x_ref.shape[3]
    first = True
    for dy in range(3):
        for dx in range(3):
            if stride == 1:
                win = x_ref[:, dy:dy + ho, dx:dx + wo, :]          # (1, ho, wo, cin)
            else:
                win = x_ref[:, pl.ds(dy, ho, stride), pl.ds(dx, wo, stride), :]
            prod = jnp.dot(win.reshape(ho * wo, cin), w_ref[dy * 3 + dx],
                           preferred_element_type=jnp.float32)
            if first:
                acc_ref[...] = prod              # init folded into first tap
                first = False
            else:
                acc_ref[...] += prod
    y = acc_ref[...] * s_ref[...] + b_ref[...]
    o_ref[...] = jnp.maximum(y, 0.0)[None].astype(o_ref.dtype)


def _pool_ca_kernel(x_ref, w1_ref, w2_ref, ca_ref, cpad_ref, *, pad):
    """One pass over the activation: channel attention + lane-dense, pre-padded
    channel-wise mean/max map (N, 2, H+2p, W+2p)."""
    h, w = x_ref.shape[1], x_ref.shape[2]
    x = x_ref[...].astype(jnp.float32)                       # (1, H, W, C)

    # channel attention: spatial avg/max stacked as (2, C), one dot per MLP layer
    avg = jnp.mean(x, axis=(1, 2))                           # (1, C)
    mx = jnp.max(x, axis=(1, 2))                             # (1, C)
    both = jnp.concatenate([avg, mx], axis=0)                # (2, C)
    hid = jnp.maximum(jnp.dot(both, w1_ref[...],
                              preferred_element_type=jnp.float32), 0.0)
    z = jnp.dot(hid, w2_ref[...], preferred_element_type=jnp.float32)
    ca_ref[...] = jax.nn.sigmoid(z[0:1] + z[1:2])[None, None]  # (1, 1, 1, C)

    # spatial-attention pooled map, lane-dense (W in lanes), padded border in-kernel
    cm = jnp.mean(x, axis=3)                                 # (1, H, W)
    cx = jnp.max(x, axis=3)                                  # (1, H, W)
    cpad_ref[...] = jnp.zeros_like(cpad_ref)
    cpad_ref[:, 0:1, pad:pad + h, pad:pad + w] = cm[:, None]
    cpad_ref[:, 1:2, pad:pad + h, pad:pad + w] = cx[:, None]


def _mix_kernel(coef_ref, wsa_ref, x_ref, ca_ref, cpad_ref, *rest,
                ksize, pad, emit_next, add_residual):
    """7x7 spatial attention (lane-dense VPU taps) fused with the CBAM mix
    y = x * (c0 + c1*ca + c2*sa).  Optionally also emits the pooled statistics
    for the NEXT attention stage (emit_next) and/or the residual add + ReLU."""
    idx = 0
    if emit_next:
        w1n_ref, w2n_ref = rest[idx], rest[idx + 1]
        idx += 2
    if add_residual:
        res_ref = rest[idx]
        idx += 1
    o_ref = rest[idx]
    idx += 1
    if emit_next:
        ca_n_ref, cpad_n_ref = rest[idx], rest[idx + 1]

    h, w = x_ref.shape[1], x_ref.shape[2]

    # ---- 7x7 spatial attention on the lane-dense padded slab ----
    cp = cpad_ref[...]                                       # (1, 2, H+2p, W+2p)
    mean_slab = cp[0, 0]                                     # (H+2p, W+2p)
    max_slab = cp[0, 1]
    acc = None
    for dy in range(ksize):
        for dx in range(ksize):
            t = dy * ksize + dx
            contrib = (mean_slab[dy:dy + h, dx:dx + w] * wsa_ref[2 * t]
                       + max_slab[dy:dy + h, dx:dx + w] * wsa_ref[2 * t + 1])
            acc = contrib if acc is None else acc + contrib
    sa = jax.nn.sigmoid(acc)                                 # (H, W)

    # ---- factored mix: y = x * (c0 + c1*ca + c2*sa) ----
    x = x_ref[...].astype(jnp.float32)                       # (1, H, W, C)
    ca = ca_ref[...]                                         # (1, 1, 1, C) f32
    c0, c1, c2 = coef_ref[0], coef_ref[1], coef_ref[2]
    gate = (c0 + c1 * ca) + c2 * sa[None, :, :, None]        # (1, H, W, C)
    y = x * gate
    if add_residual:
        y = jnp.maximum(y + res_ref[...].astype(jnp.float32), 0.0)
    o_ref[...] = y.astype(o_ref.dtype)

    # ---- pooled stats for the next attention stage (y still in VMEM) ----
    if emit_next:
        avg = jnp.mean(y, axis=(1, 2))                       # (1, C)
        mx = jnp.max(y, axis=(1, 2))                         # (1, C)
        both = jnp.concatenate([avg, mx], axis=0)            # (2, C)
        hid = jnp.maximum(jnp.dot(both, w1n_ref[...],
                                  preferred_element_type=jnp.float32), 0.0)
        z = jnp.dot(hid, w2n_ref[...], preferred_element_type=jnp.float32)
        ca_n_ref[...] = jax.nn.sigmoid(z[0:1] + z[1:2])[None, None]
        cm = jnp.mean(y, axis=3)                             # (1, H, W)
        cx = jnp.max(y, axis=3)
        cpad_n_ref[...] = jnp.zeros_like(cpad_n_ref)
        cpad_n_ref[:, 0:1, pad:pad + h, pad:pad + w] = cm[:, None]
        cpad_n_ref[:, 1:2, pad:pad + h, pad:pad + w] = cx[:, None]


# --------------------------- pallas_call wrappers --------------------------

def matmul_affine_act(x2d, w2d, scale, bias, act="none", out_dtype=jnp.bfloat16):
    m, k = x2d.shape
    k2, n = w2d.shape
    assert k == k2
    tm = _pick_tile(m, (1024, 512, 256, 128, 64, 32, 16, 8), cap=4096)
    tn = _pick_tile(n, (512, 256, 128), cap=2048)
    tk = _pick_tile(k, (1024, 512, 256, 128), cap=2048)
    mp, np_, kp = _round_up(m, tm), _round_up(n, tn), _round_up(k, tk)

    x_p = x2d if x2d.dtype == jnp.bfloat16 else x2d.astype(jnp.bfloat16)
    w_p = w2d.astype(jnp.bfloat16)
    s_p = scale.reshape(1, n).astype(jnp.float32)
    b_p = bias.reshape(1, n).astype(jnp.float32)
    # Padding is a rare fallback only (tiles normally divide the dims exactly);
    # K must be zero-padded when partial so the accumulation stays exact.
    if (mp, kp) != (m, k):
        x_p = jnp.pad(x_p, ((0, mp - m), (0, kp - k)))
    if (kp, np_) != (k, n):
        w_p = jnp.pad(w_p, ((0, kp - k), (0, np_ - n)))
        s_p = jnp.pad(s_p, ((0, 0), (0, np_ - n)))
        b_p = jnp.pad(b_p, ((0, 0), (0, np_ - n)))

    out = pl.pallas_call(
        functools.partial(_matmul_affine_act_kernel, act=act),
        out_shape=jax.ShapeDtypeStruct((mp, np_), out_dtype),
        grid_spec=pltpu.PrefetchScalarGridSpec(
            num_scalar_prefetch=0,
            grid=(mp // tm, np_ // tn, kp // tk),
            in_specs=[pl.BlockSpec((tm, tk), lambda i, j, kk: (i, kk)),
                      pl.BlockSpec((tk, tn), lambda i, j, kk: (kk, j)),
                      pl.BlockSpec((1, tn), lambda i, j, kk: (0, j)),
                      pl.BlockSpec((1, tn), lambda i, j, kk: (0, j))],
            out_specs=pl.BlockSpec((tm, tn), lambda i, j, kk: (i, j)),
            scratch_shapes=[pltpu.VMEM((tm, tn), jnp.float32)]),
        compiler_params=pltpu.CompilerParams(
            dimension_semantics=("parallel", "parallel", "arbitrary"),
            vmem_limit_bytes=_vmem_limit()),
    )(x_p, w_p, s_p, b_p)
    if (mp, np_) != (m, n):
        out = out[:m, :n]
    return out


def conv3x3_bn_relu(x_nhwc, w_oihw, scale, bias, stride=1):
    n, h, w, cin = x_nhwc.shape
    cout = w_oihw.shape[0]
    ho = (h + 2 - 3) // stride + 1
    wo = (w + 2 - 3) // stride + 1
    x_pad = jnp.pad(x_nhwc, ((0, 0), (1, 1), (1, 1), (0, 0)))
    wmat = jnp.transpose(w_oihw, (2, 3, 1, 0)).reshape(9, cin, cout).astype(jnp.bfloat16)

    # One image per grid step: whole (padded) spatial slab in VMEM, halo included.
    # TODO(synk): audit slab vs. 64 MiB VMEM on v7x for very large images; tile H if needed.
    out = pl.pallas_call(
        functools.partial(_conv3x3_bn_relu_kernel, ho=ho, wo=wo, stride=stride),
        out_shape=jax.ShapeDtypeStruct((n, ho * wo, cout), jnp.bfloat16),
        grid_spec=pltpu.PrefetchScalarGridSpec(
            num_scalar_prefetch=0,
            grid=(n,),
            in_specs=[pl.BlockSpec((1, h + 2, w + 2, cin), lambda i: (i, 0, 0, 0)),
                      pl.BlockSpec((9, cin, cout), lambda i: (0, 0, 0)),
                      pl.BlockSpec((1, cout), lambda i: (0, 0)),
                      pl.BlockSpec((1, cout), lambda i: (0, 0))],
            out_specs=pl.BlockSpec((1, ho * wo, cout), lambda i: (i, 0, 0)),
            scratch_shapes=[pltpu.VMEM((ho * wo, cout), jnp.float32)]),
        compiler_params=pltpu.CompilerParams(
            dimension_semantics=("parallel",),
            vmem_limit_bytes=_vmem_limit()),
    )(x_pad, wmat,
      scale.reshape(1, cout).astype(jnp.float32),
      bias.reshape(1, cout).astype(jnp.float32))
    return out.reshape(n, ho, wo, cout)


def conv1x1_w_to_mat(w):          # (Cout, Cin, 1, 1) -> (Cin, Cout)
    return jnp.transpose(w[:, :, 0, 0], (1, 0))


def _pack_sa_weights(sa_p):
    # (1, 2, 7, 7) -> (7, 7, 2) flattened so index 2*t = mean tap, 2*t+1 = max tap
    return jnp.transpose(sa_p["conv"][0], (1, 2, 0)).reshape(-1).astype(jnp.float32)


def attention_pipeline(out_nhwc, ca1_p, sa1_p, ca2_p, sa2_p, alpha, beta, residual):
    """Two CBAM mixing stages in three kernels:
       pool/CA1 -> (mix alpha + pools/CA2) -> (mix beta + residual + ReLU)."""
    n, h, w, c = out_nhwc.shape
    pad = SA_KSIZE // 2
    hp, wp = h + 2 * pad, w + 2 * pad

    w1a = conv1x1_w_to_mat(ca1_p["fc1"]).astype(jnp.float32)   # (C, hid)
    w2a = conv1x1_w_to_mat(ca1_p["fc2"]).astype(jnp.float32)   # (hid, C)
    w1b = conv1x1_w_to_mat(ca2_p["fc1"]).astype(jnp.float32)
    w2b = conv1x1_w_to_mat(ca2_p["fc2"]).astype(jnp.float32)
    hid = w1a.shape[1]
    wsa1 = _pack_sa_weights(sa1_p)
    wsa2 = _pack_sa_weights(sa2_p)

    img_spec = pl.BlockSpec((1, h, w, c), lambda i: (i, 0, 0, 0))
    ca_spec = pl.BlockSpec((1, 1, 1, c), lambda i: (i, 0, 0, 0))
    cpad_spec = pl.BlockSpec((1, 2, hp, wp), lambda i: (i, 0, 0, 0))
    w1_spec = pl.BlockSpec((c, hid), lambda i: (0, 0))
    w2_spec = pl.BlockSpec((hid, c), lambda i: (0, 0))
    cparams = pltpu.CompilerParams(dimension_semantics=("parallel",),
                                   vmem_limit_bytes=_vmem_limit())

    # stage 0: pools + CA1 from the bn3 output (one read of the activation)
    ca1v, cpad1 = pl.pallas_call(
        functools.partial(_pool_ca_kernel, pad=pad),
        out_shape=(jax.ShapeDtypeStruct((n, 1, 1, c), jnp.float32),
                   jax.ShapeDtypeStruct((n, 2, hp, wp), jnp.float32)),
        grid_spec=pltpu.PrefetchScalarGridSpec(
            num_scalar_prefetch=0, grid=(n,),
            in_specs=[img_spec, w1_spec, w2_spec],
            out_specs=(ca_spec, cpad_spec)),
        compiler_params=cparams,
    )(out_nhwc, w1a, w2a)

    # stage 1: mix with alpha, and emit CA2 / pooled slab for stage 2 from VMEM
    y1, ca2v, cpad2 = pl.pallas_call(
        functools.partial(_mix_kernel, ksize=SA_KSIZE, pad=pad,
                          emit_next=True, add_residual=False),
        out_shape=(jax.ShapeDtypeStruct((n, h, w, c), jnp.bfloat16),
                   jax.ShapeDtypeStruct((n, 1, 1, c), jnp.float32),
                   jax.ShapeDtypeStruct((n, 2, hp, wp), jnp.float32)),
        grid_spec=pltpu.PrefetchScalarGridSpec(
            num_scalar_prefetch=0, grid=(n,),
            in_specs=[_SMEM, _SMEM, img_spec, ca_spec, cpad_spec, w1_spec, w2_spec],
            out_specs=(img_spec, ca_spec, cpad_spec)),
        compiler_params=cparams,
    )(alpha.astype(jnp.float32), wsa1, out_nhwc, ca1v, cpad1, w1b, w2b)

    # stage 2: mix with beta, residual add, ReLU; bf16 writeback
    y2 = pl.pallas_call(
        functools.partial(_mix_kernel, ksize=SA_KSIZE, pad=pad,
                          emit_next=False, add_residual=True),
        out_shape=jax.ShapeDtypeStruct((n, h, w, c), jnp.bfloat16),
        grid_spec=pltpu.PrefetchScalarGridSpec(
            num_scalar_prefetch=0, grid=(n,),
            in_specs=[_SMEM, _SMEM, img_spec, ca_spec, cpad_spec, img_spec],
            out_specs=img_spec),
        compiler_params=cparams,
    )(beta.astype(jnp.float32), wsa2, y1, ca2v, cpad2, residual)
    return y2


# ------------------------------- glue (JAX) --------------------------------

def fold_bn(bn_params, eps=BN_EPS):
    gamma, beta, mean, var = bn_params
    scale = gamma / jnp.sqrt(var + eps)
    bias = beta - mean * scale
    return scale, bias


def bottleneck_forward(params, x_nchw, alpha, beta, stride=1):
    x = jnp.transpose(x_nchw, (0, 2, 3, 1)).astype(jnp.bfloat16)   # NHWC, bf16 once
    n, h, w, cin = x.shape

    # conv1 (1x1) + bn1 + relu
    s1, b1 = fold_bn(params["bn1"])
    w1 = conv1x1_w_to_mat(params["conv1"])
    planes = w1.shape[1]
    out = matmul_affine_act(x.reshape(n * h * w, cin), w1, s1, b1, act="relu")
    out = out.reshape(n, h, w, planes)

    # conv2 (3x3, stride, pad=1) + bn2 + relu  (in-kernel shifted-window matmuls)
    s2, b2 = fold_bn(params["bn2"])
    out = conv3x3_bn_relu(out, params["conv2"], s2, b2, stride)
    _, ho, wo, _ = out.shape

    # conv3 (1x1) + bn3 (no relu)
    s3, b3 = fold_bn(params["bn3"])
    w3 = conv1x1_w_to_mat(params["conv3"])
    cexp = w3.shape[1]
    out = matmul_affine_act(out.reshape(n * ho * wo, planes), w3, s3, b3, act="none")
    out = out.reshape(n, ho, wo, cexp)

    # shortcut (bf16)
    if "shortcut_conv" in params:
        xs = x[:, ::stride, ::stride, :]
        ss, bs = fold_bn(params["shortcut_bn"])
        ws = conv1x1_w_to_mat(params["shortcut_conv"])
        sc = matmul_affine_act(xs.reshape(n * ho * wo, cin), ws, ss, bs, act="none")
        sc = sc.reshape(n, ho, wo, cexp)
    else:
        sc = x

    # attention mixing (residual add + relu fused into the last stage)
    out = attention_pipeline(out, params["ca1"], params["sa1"],
                             params["ca2"], params["sa2"], alpha, beta, sc)

    return jnp.transpose(out, (0, 3, 1, 2)).astype(jnp.float32)   # back to NCHW


# ------------------------- pure-JAX reference model -------------------------

def _ref_conv(x, w, stride=1, pad=0):
    return jax.lax.conv_general_dilated(
        x, w, (stride, stride), [(pad, pad), (pad, pad)],
        dimension_numbers=("NCHW", "OIHW", "NCHW"), precision=_HI)


def _ref_bn(x, p):
    gamma, beta, mean, var = p
    inv = gamma / jnp.sqrt(var + BN_EPS)
    return x * inv[None, :, None, None] + (beta - mean * inv)[None, :, None, None]


def _ref_ca(x, p):
    avg = jnp.mean(x, axis=(2, 3), keepdims=True)
    mx = jnp.max(x, axis=(2, 3), keepdims=True)

    def mlp(v):
        return _ref_conv(jax.nn.relu(_ref_conv(v, p["fc1"])), p["fc2"])

    return jax.nn.sigmoid(mlp(avg) + mlp(mx))


def _ref_sa(x, p):
    avg = jnp.mean(x, axis=1, keepdims=True)
    mx = jnp.max(x, axis=1, keepdims=True)
    cat = jnp.concatenate([avg, mx], axis=1)
    return jax.nn.sigmoid(_ref_conv(cat, p["conv"], pad=SA_KSIZE // 2))


def ref_forward(params, x, alpha, beta, stride=1):
    out = jax.nn.relu(_ref_bn(_ref_conv(x, params["conv1"]), params["bn1"]))
    out = jax.nn.relu(_ref_bn(_ref_conv(out, params["conv2"], stride, 1),
                              params["bn2"]))
    out = _ref_bn(_ref_conv(out, params["conv3"]), params["bn3"])
    out = (out * alpha[0] + out * _ref_ca(out, params["ca1"]) * alpha[1]
           + out * _ref_sa(out, params["sa1"]) * alpha[2])
    out = (out * beta[0] + out * _ref_ca(out, params["ca2"]) * beta[1]
           + out * _ref_sa(out, params["sa2"]) * beta[2])
    if "shortcut_conv" in params:
        sc = _ref_bn(_ref_conv(x, params["shortcut_conv"], stride),
                     params["shortcut_bn"])
    else:
        sc = x
    return jax.nn.relu(out + sc)


# ------------------------------ param init ----------------------------------

def init_params(key, in_planes, planes, stride):
    cexp = EXPANSION * planes
    hidden = max(cexp // CA_RATIO, 1)
    keys = list(jax.random.split(key, 16))
    ki = iter(keys)

    def conv_w(k, cout, cin, kh, kw):
        return (jax.random.normal(k, (cout, cin, kh, kw), jnp.float32)
                / jnp.sqrt(cin * kh * kw))

    def bn_p(k, c):
        k1, k2, k3, k4 = jax.random.split(k, 4)
        gamma = 1.0 + 0.1 * jax.random.normal(k1, (c,), jnp.float32)
        beta = 0.1 * jax.random.normal(k2, (c,), jnp.float32)
        mean = 0.1 * jax.random.normal(k3, (c,), jnp.float32)
        var = 0.5 + jax.random.uniform(k4, (c,), jnp.float32)
        return (gamma, beta, mean, var)

    params = {
        "conv1": conv_w(next(ki), planes, in_planes, 1, 1),
        "bn1": bn_p(next(ki), planes),
        "conv2": conv_w(next(ki), planes, planes, 3, 3),
        "bn2": bn_p(next(ki), planes),
        "conv3": conv_w(next(ki), cexp, planes, 1, 1),
        "bn3": bn_p(next(ki), cexp),
        "ca1": {"fc1": conv_w(next(ki), hidden, cexp, 1, 1),
                "fc2": conv_w(next(ki), cexp, hidden, 1, 1)},
        "sa1": {"conv": conv_w(next(ki), 1, 2, SA_KSIZE, SA_KSIZE)},
        "ca2": {"fc1": conv_w(next(ki), hidden, cexp, 1, 1),
                "fc2": conv_w(next(ki), cexp, hidden, 1, 1)},
        "sa2": {"conv": conv_w(next(ki), 1, 2, SA_KSIZE, SA_KSIZE)},
    }
    if stride != 1 or in_planes != cexp:
        params["shortcut_conv"] = conv_w(next(ki), cexp, in_planes, 1, 1)
        params["shortcut_bn"] = bn_p(next(ki), cexp)
    return params


# --------------------------------- main --------------------------------------

if __name__ == "__main__":
    key = jax.random.PRNGKey(0)
    kx, kp, ka, kb = jax.random.split(key, 4)

    in_planes, planes, stride = 16, 8, 1     # expansion*planes = 32
    N, H, W = 2, 8, 8

    x = jax.random.normal(kx, (N, in_planes, H, W), jnp.float32)
    params = init_params(kp, in_planes, planes, stride)
    alpha = jax.nn.softmax(jax.random.normal(ka, (3,), jnp.float32))
    beta = jax.nn.softmax(jax.random.normal(kb, (3,), jnp.float32))

    out = bottleneck_forward(params, x, alpha, beta, stride=stride)
    out = jax.block_until_ready(out)

    ref = ref_forward(params, x, alpha, beta, stride=stride)
    ref = jax.block_until_ready(ref)

    assert out.shape == ref.shape, (out.shape, ref.shape)
    # bf16 storage + bf16 MXU inputs (f32 accumulation) vs. an f32 HIGHEST-precision
    # reference: allow a few percent per-element tolerance.
    ok = bool(jnp.all(jnp.abs(out - ref) <= 6e-2 + 3e-2 * jnp.abs(ref)))
    assert ok, "mismatch vs reference"

    print("KERNEL_OK")
</pallas_src>

<mosaic_0001>
module attributes {stable_mosaic.version = 11 : i64} {
  func.func @_matmul_affine_act_kernel(%arg0: i32, %arg1: i32, %arg2: i32, %arg3: memref<128x16xbf16, #tpu.memory_space<vmem>>, %arg4: memref<16x8xbf16, #tpu.memory_space<vmem>>, %arg5: memref<1x8xf32, #tpu.memory_space<vmem>>, %arg6: memref<1x8xf32, #tpu.memory_space<vmem>>, %arg7: memref<128x8xbf16, #tpu.memory_space<vmem>>, %arg8: memref<128x8xf32, #tpu.memory_space<vmem>>) attributes {dimension_semantics = [#tpu.dimension_semantics<parallel>, #tpu.dimension_semantics<parallel>, #tpu.dimension_semantics<arbitrary>], iteration_bounds = array<i64: 1, 1, 1>, scalar_prefetch = 0 : i64, scratch_operands = 1 : i64, tpu.core_type = #tpu.core_type<tc>, window_params = [{transform_indices = @transform_0, window_bounds = array<i64: 128, 16>}, {transform_indices = @transform_1, window_bounds = array<i64: 16, 8>}, {transform_indices = @transform_2, window_bounds = array<i64: 1, 8>}, {transform_indices = @transform_3, window_bounds = array<i64: 1, 8>}, {transform_indices = @transform_4, window_bounds = array<i64: 128, 8>}]} {
    %c0 = arith.constant 0 : index
    %c0_0 = arith.constant 0 : index
    %0 = vector.load %arg3[%c0, %c0_0] : memref<128x16xbf16, #tpu.memory_space<vmem>>, vector<128x16xbf16>
    %c0_1 = arith.constant 0 : index
    %c0_2 = arith.constant 0 : index
    %1 = vector.load %arg4[%c0_1, %c0_2] : memref<16x8xbf16, #tpu.memory_space<vmem>>, vector<16x8xbf16>
    %cst = arith.constant dense<0.000000e+00> : vector<128x8xf32>
    %2 = tpu.matmul %0, %1, %cst {dimension_numbers = #tpu.dot_dimension_numbers<[1], [0], [0], [1], [0, 0, 1, 1], [], []>} : vector<128x16xbf16>, vector<16x8xbf16>, vector<128x8xf32> -> vector<128x8xf32>
    %c0_i32 = arith.constant 0 : i32
    %3 = arith.cmpi eq, %arg2, %c0_i32 : i32
    %4 = arith.extui %3 : i1 to i32
    %c0_i32_3 = arith.constant 0 : i32
    %5 = arith.cmpi ne, %4, %c0_i32_3 : i32
    scf.if %5 {
      %c0_8 = arith.constant 0 : index
      %c0_9 = arith.constant 0 : index
      %12 = vector.load %arg8[%c0_8, %c0_9] : memref<128x8xf32, #tpu.memory_space<vmem>>, vector<128x8xf32>
      tpu.vector_store %arg8[%c0_8, %c0_9], %2 {strides = array<i32>} : memref<128x8xf32, #tpu.memory_space<vmem>>, vector<128x8xf32>,
    } else {
    }
    %c0_i32_4 = arith.constant 0 : i32
    %6 = arith.cmpi sgt, %arg2, %c0_i32_4 : i32
    %7 = arith.extui %6 : i1 to i32
    %c0_i32_5 = arith.constant 0 : i32
    %8 = arith.cmpi ne, %7, %c0_i32_5 : i32
    scf.if %8 {
      %c0_8 = arith.constant 0 : index
      %c0_9 = arith.constant 0 : index
      %12 = vector.load %arg8[%c0_8, %c0_9] : memref<128x8xf32, #tpu.memory_space<vmem>>, vector<128x8xf32>
      %13 = arith.addf %12, %2 : vector<128x8xf32>
      %c0_10 = arith.constant 0 : index
      %c0_11 = arith.constant 0 : index
      %14 = vector.load %arg8[%c0_10, %c0_11] : memref<128x8xf32, #tpu.memory_space<vmem>>, vector<128x8xf32>
      tpu.vector_store %arg8[%c0_10, %c0_11], %13 {strides = array<i32>} : memref<128x8xf32, #tpu.memory_space<vmem>>, vector<128x8xf32>,
    } else {
    }
    %c0_i32_6 = arith.constant 0 : i32
    %9 = arith.cmpi eq, %arg2, %c0_i32_6 : i32
    %10 = arith.extui %9 : i1 to i32
    %c0_i32_7 = arith.constant 0 : i32
    %11 = arith.cmpi ne, %10, %c0_i32_7 : i32
    scf.if %11 {
      %c0_8 = arith.constant 0 : index
      %c0_9 = arith.constant 0 : index
      %12 = vector.load %arg8[%c0_8, %c0_9] : memref<128x8xf32, #tpu.memory_space<vmem>>, vector<128x8xf32>
      %c0_10 = arith.constant 0 : index
      %c0_11 = arith.constant 0 : index
      %13 = vector.load %arg5[%c0_10, %c0_11] : memref<1x8xf32, #tpu.memory_space<vmem>>, vector<1x8xf32>
      %14 = vector.broadcast %13 : vector<1x8xf32> to vector<128x8xf32>
      %15 = arith.mulf %12, %14 : vector<128x8xf32>
      %c0_12 = arith.constant 0 : index
      %c0_13 = arith.constant 0 : index
      %16 = vector.load %arg6[%c0_12, %c0_13] : memref<1x8xf32, #tpu.memory_space<vmem>>, vector<1x8xf32>
      %17 = vector.broadcast %16 : vector<1x8xf32> to vector<128x8xf32>
      %18 = arith.addf %15, %17 : vector<128x8xf32>
      %cst_14 = arith.constant 0.000000e+00 : f32
      %19 = vector.broadcast %cst_14 : f32 to vector<128x8xf32>
      %20 = arith.maximumf %18, %19 : vector<128x8xf32>
      %21 = arith.truncf %20 : vector<128x8xf32> to vector<128x8xbf16>
      %c0_15 = arith.constant 0 : index
      %c0_16 = arith.constant 0 : index
      %22 = vector.load %arg7[%c0_15, %c0_16] : memref<128x8xbf16, #tpu.memory_space<vmem>>, vector<128x8xbf16>
      tpu.vector_store %arg7[%c0_15, %c0_16], %21 {strides = array<i32>} : memref<128x8xbf16, #tpu.memory_space<vmem>>, vector<128x8xbf16>,
    } else {
    }
    return
  }
  func.func @transform_0(%arg0: i32, %arg1: i32, %arg2: i32) -> (i32, i32) {
    %c0_i32 = arith.constant 0 : i32
    return %arg0, %arg2 : i32, i32
  }
  func.func @transform_1(%arg0: i32, %arg1: i32, %arg2: i32) -> (i32, i32) {
    %c0_i32 = arith.constant 0 : i32
    return %arg2, %arg1 : i32, i32
  }
  func.func @transform_2(%arg0: i32, %arg1: i32, %arg2: i32) -> (i32, i32) {
    %c0_i32 = arith.constant 0 : i32
    %c0_i32_0 = arith.constant 0 : i32
    return %c0_i32, %arg1 : i32, i32
  }
  func.func @transform_3(%arg0: i32, %arg1: i32, %arg2: i32) -> (i32, i32) {
    %c0_i32 = arith.constant 0 : i32
    %c0_i32_0 = arith.constant 0 : i32
    return %c0_i32, %arg1 : i32, i32
  }
  func.func @transform_4(%arg0: i32, %arg1: i32, %arg2: i32) -> (i32, i32) {
    %c0_i32 = arith.constant 0 : i32
    return %arg0, %arg1 : i32, i32
  }
}

</mosaic_0001>

<bundles_post_ra>
// kernel: tpu_custom_call.1
= control target key start
LH: loop header
LB: loop body
LE: loop exit
PB: predicated region body
PF: predicated region fallthrough
CT: control target
= control target key end

     0   :  { %vm82_vm0 = vcmask 130048   ;;  %vm208_vm1 = vcmask 64512   ;;  %vm423_vm2 = vcmask 60416   ;;  %s715_s1 = inlined_call_operand.vmem [shape: bf16[16,8], index: 1, kind: input, shape index: {}]   ;;  %s716_s0 = inlined_call_operand.vmem [shape: bf16[128,16], index: 0, kind: input, shape index: {}]   ;;  %s717_s2 = inlined_call_operand.vmem [shape: f32[1,8], index: 2, kind: input, shape index: {}]   ;;  %s718_s3 = inlined_call_operand.vmem [shape: f32[1,8], index: 3, kind: input, shape index: {}]   ;;  %s719_s4 = inlined_call_operand.vmem [shape: bf16[128,8], index: 4, kind: output, shape index: {}]  }
   0x1   :  { %v524_v0 = vld [vmem:[%s715_s1] sm:$0xff]   ;;  %v527_v3 = vld [vmem:[%s716_s0 + $0x8] sm:$0xff]   ;;  %v529_v5 = vld [vmem:[%s716_s0 + $0x10] sm:$0xff]  }
   0x2   :  { %v525_v1 = vld [vmem:[%s716_s0] sm:$0xff]   ;;  %504 = vmatprep.subr.bf16.mxu0 %v524_v0  ;;  %522 = vmatprep.subr.bf16.mxu1 %v524_v0  ;;  %v528_v4 = vld [vmem:[%s716_s0 + $0x28] sm:$0xff]   ;;  %v530_v6 = vld [vmem:[%s716_s0 + $0x30] sm:$0xff]  }
   0x3   :  { %v526_v2 = vld [vmem:[%s716_s0 + $0x20] sm:$0xff]   ;;  %505 = vmatpush3.bf16.msra.mxu0 %v524_v0  ;;  %523 = vmatpush3.bf16.msra.mxu1 %v524_v0  ;;  %v531_v7 = vld [vmem:[%s716_s0 + $0x18] sm:$0xff]  }
   0x4   :  { %506 = vmatprep.mubr.msk.bf16.mxu0 %vm82_vm0, %v525_v1  ;;  %514 = vmatprep.mubr.msk.bf16.mxu1 %vm82_vm0, %v526_v2  ;;  %v532_v8 = vld [vmem:[%s716_s0 + $0x38] sm:$0xff]   ;;  %v604_v17 = vld [vmem:[%s717_s2] ss:$0 sm:$0xff] }
   0x5   :  { %v609_v19 = vld [vmem:[%s718_s3] ss:$0 sm:$0xff] }
   0x6   :  { %507 = vmatmul.mubr.msk.bf16.vlgmr.msra.gmra.mrb[0].mxu0 %vm82_vm0, %v527_v3  ;;  %515 = vmatmul.mubr.msk.bf16.vlgmr.msra.gmra.mrb[0].mxu1 %vm82_vm0, %v528_v4 }
   0x7   :  { %510 = vmatprep.mubr.msk.bf16.mxu0 %vm82_vm0, %v529_v5  ;;  %518 = vmatprep.mubr.msk.bf16.mxu1 %vm82_vm0, %v530_v6 }
   0xe   :  { %511 = vmatmul.mubr.msk.bf16.gmra.mrb[4].mxu0 %vm82_vm0, %v531_v7  ;;  %519 = vmatmul.mubr.msk.bf16.gmra.mrb[4].mxu1 %vm82_vm0, %v532_v8 }
  0xd9   :  { %v508_v9 = vpop.f32.mrb[0].mxu0  ;;  %v516_v10 = vpop.f32.mrb[0].mxu1 }
  0xda   :  { %211 = vst.msk [vmem:[#allocation2 + $0x10] sm:$0xff] %vm208_vm1, %v508_v9  ;;  %219 = vst.msk [vmem:[#allocation2 + $0x50] sm:$0xff] %vm208_vm1, %v516_v10  ;;  %v141_v11 = vpop.f32.mrb[1].mxu0  ;;  %v173_v12 = vpop.f32.mrb[1].mxu1 }
  0xdb   :  { %209 = vst.msk [vmem:[#allocation2] sm:$0xff] %vm208_vm1, %v141_v11  ;;  %217 = vst.msk [vmem:[#allocation2 + $0x40] sm:$0xff] %vm208_vm1, %v173_v12  ;;  %v509_v13 = vpop.f32.mrb[2].mxu0  ;;  %v517_v14 = vpop.f32.mrb[2].mxu1 }
  0xdc   :  { %212 = vst.msk [vmem:[#allocation2 + $0x18] sm:$0xff] %vm208_vm1, %v509_v13  ;;  %220 = vst.msk [vmem:[#allocation2 + $0x58] sm:$0xff] %vm208_vm1, %v517_v14  ;;  %v144_v15 = vpop.f32.mrb[3].mxu0  ;;  %v176_v16 = vpop.f32.mrb[3].mxu1 }
  0xdd   :  { %210 = vst.msk [vmem:[#allocation2 + $0x8] sm:$0xff] %vm208_vm1, %v144_v15  ;;  %218 = vst.msk [vmem:[#allocation2 + $0x48] sm:$0xff] %vm208_vm1, %v176_v16 }
  0xe1   :  { %v283_v18 = vld [vmem:[#allocation2 + $0x10] sm:$0xff]  ;;  %v512_v21 = vpop.f32.mrb[4].mxu0  ;;  %v520_v22 = vpop.f32.mrb[4].mxu1 }
  0xe2   :  { %v291_v20 = vld [vmem:[#allocation2 + $0x50] sm:$0xff]  ;;  %v306_v23 = vmul.f32 %v604_v17, %v283_v18  ;;  %v281_v25 = vld [vmem:[#allocation2] sm:$0xff]  ;;  %215 = vst.msk [vmem:[#allocation2 + $0x30] sm:$0xff] %vm208_vm1, %v512_v21  ;;  %223 = vst.msk [vmem:[#allocation2 + $0x70] sm:$0xff] %vm208_vm1, %v520_v22  ;;  %v157_v27 = vpop.f32.mrb[5].mxu0  ;;  %v189_v28 = vpop.f32.mrb[5].mxu1 }
  0xe3   :  { %v314_v24 = vmul.f32 %v604_v17, %v291_v20  ;;  %v289_v26 = vld [vmem:[#allocation2 + $0x40] sm:$0xff]  ;;  %v304_v29 = vmul.f32 %v604_v17, %v281_v25  ;;  %v284_v31 = vld [vmem:[#allocation2 + $0x18] sm:$0xff]  ;;  %213 = vst.msk [vmem:[#allocation2 + $0x20] sm:$0xff] %vm208_vm1, %v157_v27  ;;  %221 = vst.msk [vmem:[#allocation2 + $0x60] sm:$0xff] %vm208_vm1, %v189_v28  ;;  %v513_v33 = vpop.f32.mrb[6].mxu0  ;;  %v521_v34 = vpop.f32.mrb[6].mxu1 }
  0xe4   :  { %v312_v30 = vmul.f32 %v604_v17, %v289_v26  ;;  %v292_v32 = vld [vmem:[#allocation2 + $0x58] sm:$0xff]  ;;  %v329_v35 = vadd.f32 %v609_v19, %v306_v23  ;;  %v307_v37 = vmul.f32 %v604_v17, %v284_v31  ;;  %v282_v39 = vld [vmem:[#allocation2 + $0x8] sm:$0xff]  ;;  %216 = vst.msk [vmem:[#allocation2 + $0x38] sm:$0xff] %vm208_vm1, %v513_v33  ;;  %224 = vst.msk [vmem:[#allocation2 + $0x78] sm:$0xff] %vm208_vm1, %v521_v34  ;;  %v160_v41 = vpop.f32.mrb[7].mxu0  ;;  %v192_v42 = vpop.f32.mrb[7].mxu1 }
  0xe5   :  { %v337_v36 = vadd.f32 %v609_v19, %v314_v24  ;;  %v315_v38 = vmul.f32 %v604_v17, %v292_v32  ;;  %v290_v40 = vld [vmem:[#allocation2 + $0x48] sm:$0xff]  ;;  %v327_v43 = vadd.f32 %v609_v19, %v304_v29  ;;  %v305_v45 = vmul.f32 %v604_v17, %v282_v39  ;;  %214 = vst.msk [vmem:[#allocation2 + $0x28] sm:$0xff] %vm208_vm1, %v160_v41 }
  0xe6   :  { %v335_v44 = vadd.f32 %v609_v19, %v312_v30  ;;  %v313_v46 = vmul.f32 %v604_v17, %v290_v40  ;;  %222 = vst.msk [vmem:[#allocation2 + $0x68] sm:$0xff] %vm208_vm1, %v192_v42  ;;  %v345_v47 = vmax.f32 %v329_v35, 0.0  ;;  %v330_v49 = vadd.f32 %v609_v19, %v307_v37 }
  0xe7   :  { %v353_v48 = vmax.f32 %v337_v36, 0.0  ;;  %v338_v50 = vadd.f32 %v609_v19, %v315_v38  ;;  %v343_v51 = vmax.f32 %v327_v43, 0.0  ;;  %v328_v53 = vadd.f32 %v609_v19, %v305_v45 }
  0xe8   :  { %v351_v52 = vmax.f32 %v335_v44, 0.0  ;;  %v336_v54 = vadd.f32 %v609_v19, %v313_v46  ;;  %v481_v55 = vpack.c.bf16 %v345_v47, %v345_v47  ;;  %v346_v57 = vmax.f32 %v330_v49, 0.0 }
  0xe9   :  { %v489_v56 = vpack.c.bf16 %v353_v48, %v353_v48  ;;  %v354_v58 = vmax.f32 %v338_v50, 0.0  ;;  %v479_v59 = vpack.c.bf16 %v343_v51, %v343_v51  ;;  %v344_v61 = vmax.f32 %v328_v53, 0.0  ;;  %v287_v63 = vld [vmem:[#allocation2 + $0x30] sm:$0xff] }
  0xea   :  { %v487_v60 = vpack.c.bf16 %v351_v52, %v351_v52  ;;  %v352_v62 = vmax.f32 %v336_v54, 0.0  ;;  %v295_v0 = vld [vmem:[#allocation2 + $0x70] sm:$0xff]  ;;  %426 = vst.msk [vmem:[%s719_s4 + $0x8] sm:$0xf] %vm423_vm2, %v481_v55  ;;  %v482_v1 = vpack.c.bf16 %v346_v57, %v346_v57  ;;  %v310_v3 = vmul.f32 %v604_v17, %v287_v63  ;;  %v285_v5 = vld [vmem:[#allocation2 + $0x20] sm:$0xff] }
  0xeb   :  { %434 = vst.msk [vmem:[%s719_s4 + $0x28] sm:$0xf] %vm423_vm2, %v489_v56  ;;  %v490_v2 = vpack.c.bf16 %v354_v58, %v354_v58  ;;  %v318_v4 = vmul.f32 %v604_v17, %v295_v0  ;;  %v293_v6 = vld [vmem:[#allocation2 + $0x60] sm:$0xff]  ;;  %424 = vst.msk [vmem:[%s719_s4] sm:$0xf] %vm423_vm2, %v479_v59  ;;  %v480_v7 = vpack.c.bf16 %v344_v61, %v344_v61  ;;  %v288_v11 = vld [vmem:[#allocation2 + $0x38] sm:$0xff] }
  0xec   :  { %432 = vst.msk [vmem:[%s719_s4 + $0x20] sm:$0xf] %vm423_vm2, %v487_v60  ;;  %v488_v8 = vpack.c.bf16 %v352_v62, %v352_v62  ;;  %v308_v9 = vmul.f32 %v604_v17, %v285_v5  ;;  %v316_v10 = vmul.f32 %v604_v17, %v293_v6  ;;  %v296_v12 = vld [vmem:[#allocation2 + $0x78] sm:$0xff]  ;;  %427 = vst.msk [vmem:[%s719_s4 + $0xc] sm:$0xf] %vm423_vm2, %v482_v1  ;;  %v286_v18 = vld [vmem:[#allocation2 + $0x28] sm:$0xff] }
  0xed   :  { %435 = vst.msk [vmem:[%s719_s4 + $0x2c] sm:$0xf] %vm423_vm2, %v490_v2  ;;  %v333_v13 = vadd.f32 %v609_v19, %v310_v3  ;;  %v341_v14 = vadd.f32 %v609_v19, %v318_v4  ;;  %v311_v15 = vmul.f32 %v604_v17, %v288_v11  ;;  %v319_v16 = vmul.f32 %v604_v17, %v296_v12  ;;  %v294_v20 = vld [vmem:[#allocation2 + $0x68] sm:$0xff] }
  0xee   :  { %425 = vst.msk [vmem:[%s719_s4 + $0x4] sm:$0xf] %vm423_vm2, %v480_v7  ;;  %433 = vst.msk [vmem:[%s719_s4 + $0x24] sm:$0xf] %vm423_vm2, %v488_v8  ;;  %v331_v21 = vadd.f32 %v609_v19, %v308_v9  ;;  %v339_v22 = vadd.f32 %v609_v19, %v316_v10  ;;  %v309_v23 = vmul.f32 %v604_v17, %v286_v18 }
  0xef   :  { %v317_v24 = vmul.f32 %v604_v17, %v294_v20  ;;  %v349_v25 = vmax.f32 %v333_v13, 0.0  ;;  %v357_v26 = vmax.f32 %v341_v14, 0.0  ;;  %v334_v27 = vadd.f32 %v609_v19, %v311_v15 }
  0xf0   :  { %v342_v28 = vadd.f32 %v609_v19, %v319_v16  ;;  %v347_v29 = vmax.f32 %v331_v21, 0.0  ;;  %v355_v30 = vmax.f32 %v339_v22, 0.0  ;;  %v332_v31 = vadd.f32 %v609_v19, %v309_v23 }
  0xf1   :  { %v340_v32 = vadd.f32 %v609_v19, %v317_v24  ;;  %v485_v33 = vpack.c.bf16 %v349_v25, %v349_v25  ;;  %v493_v34 = vpack.c.bf16 %v357_v26, %v357_v26  ;;  %v350_v35 = vmax.f32 %v334_v27, 0.0 }
  0xf2   :  { %v358_v36 = vmax.f32 %v342_v28, 0.0  ;;  %v483_v37 = vpack.c.bf16 %v347_v29, %v347_v29  ;;  %v491_v38 = vpack.c.bf16 %v355_v30, %v355_v30  ;;  %v348_v39 = vmax.f32 %v332_v31, 0.0 }
  0xf3   :  { %v356_v17 = vmax.f32 %v340_v32, 0.0  ;;  %430 = vst.msk [vmem:[%s719_s4 + $0x18] sm:$0xf] %vm423_vm2, %v485_v33  ;;  %438 = vst.msk [vmem:[%s719_s4 + $0x38] sm:$0xf] %vm423_vm2, %v493_v34  ;;  %v486_v40 = vpack.c.bf16 %v350_v35, %v350_v35 }
  0xf4   :  { %v494_v19 = vpack.c.bf16 %v358_v36, %v358_v36  ;;  %428 = vst.msk [vmem:[%s719_s4 + $0x10] sm:$0xf] %vm423_vm2, %v483_v37  ;;  %436 = vst.msk [vmem:[%s719_s4 + $0x30] sm:$0xf] %vm423_vm2, %v491_v38  ;;  %v484_v41 = vpack.c.bf16 %v348_v39, %v348_v39 }
  0xf5   :  { %v492_v42 = vpack.c.bf16 %v356_v17, %v356_v17  ;;  %431 = vst.msk [vmem:[%s719_s4 + $0x1c] sm:$0xf] %vm423_vm2, %v486_v40 }
  0xf6   :  { %439 = vst.msk [vmem:[%s719_s4 + $0x3c] sm:$0xf] %vm423_vm2, %v494_v19  ;;  %429 = vst.msk [vmem:[%s719_s4 + $0x14] sm:$0xf] %vm423_vm2, %v484_v41 }
  0xf7   :  { %437 = vst.msk [vmem:[%s719_s4 + $0x34] sm:$0xf] %vm423_vm2, %v492_v42 }

</bundles_post_ra>
